<compile_context>
chip_gen: v7x
topology: tpu7x:2x2x1
jax: 0.10.0
libtpu: 0.0.40
codegen_flags: <defaults>
</compile_context>

<pallas_src>
import functools

import jax
import jax.numpy as jnp
from jax.experimental import pallas as pl
from jax.experimental.pallas import tpu as pltpu


def _adaptor_kernel(w_ref, b_ref, x_ref, o_ref, *, cin, cout):
    # w_ref: (cout, cin) f32 in SMEM; b_ref: (cout,) f32 in SMEM
    # x_ref: (cin, rows, 128) in VMEM; o_ref: (cout, rows, 128) in VMEM
    # Load each input channel once as a lane/sublane-dense (rows, 128) slab,
    # then run an unrolled scalar-broadcast FMA chain per output channel.
    xs = [x_ref[i].astype(jnp.float32) for i in range(cin)]
    for c in range(cout):
        acc = xs[0] * w_ref[c, 0] + b_ref[c]
        for i in range(1, cin):
            acc = acc + xs[i] * w_ref[c, i]
        o_ref[c] = acc.astype(o_ref.dtype)


def linear_adaptor_pallas(x_nchw, weight, bias, mean, std, *,
                          is_pretrain=False, max_rows=512):
    """x_nchw: (N, Cin, H, W); weight: (Cout, Cin) (1x1 conv kernel squeezed);
    bias/mean/std: (Cout,). Returns (N, Cout, H, W)."""
    N, Cin, H, W = x_nchw.shape
    Cout = weight.shape[0]
    HW = H * W

    # Fold ImageNet normalization into the conv weights/bias (done on tiny
    # Cout x Cin constants in the wrapper — free).
    w = weight.astype(jnp.float32)
    b = bias.astype(jnp.float32)
    if not is_pretrain:
        inv_std = 1.0 / std.astype(jnp.float32)
        w = w * inv_std[:, None]
        b = (b - mean.astype(jnp.float32)) * inv_std

    # Spatial pixels fill both the sublane ("rows") and lane (128) axes.
    rows_total = -(-HW // 128)                       # ceil(HW / 128)
    if rows_total <= max_rows:
        trows, rows_pad = rows_total, rows_total     # full extent: no (8,128) rule
    else:
        trows = 0
        for t in range(max_rows, 7, -8):             # largest mult-of-8 divisor
            if rows_total % t == 0:
                trows = t
                break
        if trows:
            rows_pad = rows_total
        else:                                        # no clean divisor -> pad
            trows = max_rows
            rows_pad = -(-rows_total // trows) * trows

    hw_pad = rows_pad * 128
    x = x_nchw.reshape(N, Cin, HW)
    if hw_pad != HW:
        x = jnp.pad(x, ((0, 0), (0, 0), (0, hw_pad - HW)))
    x = x.reshape(N, Cin, rows_pad, 128)             # pure reshape, no transpose

    grid = (N, rows_pad // trows)
    kernel = functools.partial(_adaptor_kernel, cin=Cin, cout=Cout)

    out = pl.pallas_call(
        kernel,
        out_shape=jax.ShapeDtypeStruct((N, Cout, rows_pad, 128), x_nchw.dtype),
        grid_spec=pltpu.PrefetchScalarGridSpec(
            num_scalar_prefetch=0,
            grid=grid,
            in_specs=[
                # tiny folded weight/bias live in SMEM, read as scalars
                pl.BlockSpec(memory_space=pltpu.MemorySpace.SMEM),
                pl.BlockSpec(memory_space=pltpu.MemorySpace.SMEM),
                # (8,128)-dense spatial blocks; N dim squeezed out of the kernel
                pl.BlockSpec((None, Cin, trows, 128), lambda n, j: (n, 0, j, 0)),
            ],
            out_specs=pl.BlockSpec((None, Cout, trows, 128),
                                   lambda n, j: (n, 0, j, 0)),
        ),
        compiler_params=pltpu.CompilerParams(
            dimension_semantics=("parallel", "parallel")),
    )(w, b, x)

    out = out.reshape(N, Cout, hw_pad)
    if hw_pad != HW:
        out = out[:, :, :HW]
    return out.reshape(N, Cout, H, W)


if __name__ == "__main__":
    # Module config: LinearAdaptor(k=4, is_pretrain=False) -> Conv2d(4, 3, 1)
    k = 4          # input channels
    cout = 3       # output channels (fixed by the module)
    N, H, W = 2, 16, 16

    key = jax.random.PRNGKey(0)
    kx, kw, kb = jax.random.split(key, 3)

    x = jax.random.normal(kx, (N, k, H, W), dtype=jnp.float32)

    # Deterministic parameter init mimicking nn.Conv2d(k, 3, kernel_size=1).
    bound = 1.0 / jnp.sqrt(float(k))
    weight = jax.random.uniform(kw, (cout, k), minval=-bound, maxval=bound,
                                dtype=jnp.float32)
    bias = jax.random.uniform(kb, (cout,), minval=-bound, maxval=bound,
                              dtype=jnp.float32)

    mean = jnp.array([0.485, 0.456, 0.406], dtype=jnp.float32)
    std = jnp.array([0.229, 0.224, 0.225], dtype=jnp.float32)

    # Main path: conv + normalization (is_pretrain=False)
    out = linear_adaptor_pallas(x, weight, bias, mean, std, is_pretrain=False)
    out = jax.block_until_ready(out)

    ref = jnp.einsum("nchw,oc->nohw", x, weight) + bias.reshape(1, -1, 1, 1)
    ref = (ref - mean.reshape(1, -1, 1, 1)) / std.reshape(1, -1, 1, 1)
    assert out.shape == (N, cout, H, W)
    assert jnp.allclose(out, ref, atol=2e-5, rtol=1e-5)

    # Pretrain path: conv only (is_pretrain=True)
    out_p = linear_adaptor_pallas(x, weight, bias, mean, std, is_pretrain=True)
    out_p = jax.block_until_ready(out_p)
    ref_p = jnp.einsum("nchw,oc->nohw", x, weight) + bias.reshape(1, -1, 1, 1)
    assert jnp.allclose(out_p, ref_p, atol=2e-5, rtol=1e-5)

    print("KERNEL_OK")
</pallas_src>

<mosaic_0001>
module attributes {stable_mosaic.version = 11 : i64} {
  func.func @_adaptor_kernel(%arg0: i32, %arg1: i32, %arg2: memref<3x4xf32, #tpu.memory_space<smem>>, %arg3: memref<3xf32, #tpu.memory_space<smem>>, %arg4: memref<1x4x2x128xf32, #tpu.memory_space<vmem>>, %arg5: memref<1x3x2x128xf32, #tpu.memory_space<vmem>>) attributes {dimension_semantics = [#tpu.dimension_semantics<parallel>, #tpu.dimension_semantics<parallel>], iteration_bounds = array<i64: 2, 1>, scalar_prefetch = 0 : i64, scratch_operands = 0 : i64, tpu.core_type = #tpu.core_type<tc>, window_params = [{transform_indices = @transform_0, window_bounds = array<i64: 3, 4>}, {transform_indices = @transform_1, window_bounds = array<i64: 3>}, {transform_indices = @transform_2, window_bounds = array<i64: 1, 4, 2, 128>}, {transform_indices = @transform_3, window_bounds = array<i64: 1, 3, 2, 128>}]} {
    %c0 = arith.constant 0 : index
    %c0_0 = arith.constant 0 : index
    %c0_1 = arith.constant 0 : index
    %c0_2 = arith.constant 0 : index
    %0 = vector.load %arg4[%c0, %c0_0, %c0_1, %c0_2] : memref<1x4x2x128xf32, #tpu.memory_space<vmem>>, vector<1x1x2x128xf32>
    %1 = vector.shape_cast %0 : vector<1x1x2x128xf32> to vector<2x128xf32>
    %c0_3 = arith.constant 0 : index
    %c1 = arith.constant 1 : index
    %c0_4 = arith.constant 0 : index
    %c0_5 = arith.constant 0 : index
    %2 = vector.load %arg4[%c0_3, %c1, %c0_4, %c0_5] : memref<1x4x2x128xf32, #tpu.memory_space<vmem>>, vector<1x1x2x128xf32>
    %3 = vector.shape_cast %2 : vector<1x1x2x128xf32> to vector<2x128xf32>
    %c0_6 = arith.constant 0 : index
    %c2 = arith.constant 2 : index
    %c0_7 = arith.constant 0 : index
    %c0_8 = arith.constant 0 : index
    %4 = vector.load %arg4[%c0_6, %c2, %c0_7, %c0_8] : memref<1x4x2x128xf32, #tpu.memory_space<vmem>>, vector<1x1x2x128xf32>
    %5 = vector.shape_cast %4 : vector<1x1x2x128xf32> to vector<2x128xf32>
    %c0_9 = arith.constant 0 : index
    %c3 = arith.constant 3 : index
    %c0_10 = arith.constant 0 : index
    %c0_11 = arith.constant 0 : index
    %6 = vector.load %arg4[%c0_9, %c3, %c0_10, %c0_11] : memref<1x4x2x128xf32, #tpu.memory_space<vmem>>, vector<1x1x2x128xf32>
    %7 = vector.shape_cast %6 : vector<1x1x2x128xf32> to vector<2x128xf32>
    %c0_12 = arith.constant 0 : index
    %c0_13 = arith.constant 0 : index
    %8 = memref.load %arg2[%c0_12, %c0_13] : memref<3x4xf32, #tpu.memory_space<smem>>
    %9 = vector.broadcast %8 : f32 to vector<2x128xf32>
    %10 = arith.mulf %1, %9 : vector<2x128xf32>
    %c0_14 = arith.constant 0 : index
    %11 = memref.load %arg3[%c0_14] : memref<3xf32, #tpu.memory_space<smem>>
    %12 = vector.broadcast %11 : f32 to vector<2x128xf32>
    %13 = arith.addf %10, %12 : vector<2x128xf32>
    %c0_15 = arith.constant 0 : index
    %c1_16 = arith.constant 1 : index
    %14 = memref.load %arg2[%c0_15, %c1_16] : memref<3x4xf32, #tpu.memory_space<smem>>
    %15 = vector.broadcast %14 : f32 to vector<2x128xf32>
    %16 = arith.mulf %3, %15 : vector<2x128xf32>
    %17 = arith.addf %13, %16 : vector<2x128xf32>
    %c0_17 = arith.constant 0 : index
    %c2_18 = arith.constant 2 : index
    %18 = memref.load %arg2[%c0_17, %c2_18] : memref<3x4xf32, #tpu.memory_space<smem>>
    %19 = vector.broadcast %18 : f32 to vector<2x128xf32>
    %20 = arith.mulf %5, %19 : vector<2x128xf32>
    %21 = arith.addf %17, %20 : vector<2x128xf32>
    %c0_19 = arith.constant 0 : index
    %c3_20 = arith.constant 3 : index
    %22 = memref.load %arg2[%c0_19, %c3_20] : memref<3x4xf32, #tpu.memory_space<smem>>
    %23 = vector.broadcast %22 : f32 to vector<2x128xf32>
    %24 = arith.mulf %7, %23 : vector<2x128xf32>
    %25 = arith.addf %21, %24 : vector<2x128xf32>
    %c0_21 = arith.constant 0 : index
    %c0_22 = arith.constant 0 : index
    %c0_23 = arith.constant 0 : index
    %c0_24 = arith.constant 0 : index
    %26 = vector.load %arg5[%c0_21, %c0_22, %c0_23, %c0_24] : memref<1x3x2x128xf32, #tpu.memory_space<vmem>>, vector<1x1x2x128xf32>
    %27 = vector.shape_cast %26 : vector<1x1x2x128xf32> to vector<2x128xf32>
    %28 = vector.shape_cast %25 : vector<2x128xf32> to vector<1x1x2x128xf32>
    tpu.vector_store %arg5[%c0_21, %c0_22, %c0_23, %c0_24], %28 {strides = array<i32>} : memref<1x3x2x128xf32, #tpu.memory_space<vmem>>, vector<1x1x2x128xf32>,
    %c1_25 = arith.constant 1 : index
    %c0_26 = arith.constant 0 : index
    %29 = memref.load %arg2[%c1_25, %c0_26] : memref<3x4xf32, #tpu.memory_space<smem>>
    %30 = vector.broadcast %29 : f32 to vector<2x128xf32>
    %31 = arith.mulf %1, %30 : vector<2x128xf32>
    %c1_27 = arith.constant 1 : index
    %32 = memref.load %arg3[%c1_27] : memref<3xf32, #tpu.memory_space<smem>>
    %33 = vector.broadcast %32 : f32 to vector<2x128xf32>
    %34 = arith.addf %31, %33 : vector<2x128xf32>
    %c1_28 = arith.constant 1 : index
    %c1_29 = arith.constant 1 : index
    %35 = memref.load %arg2[%c1_28, %c1_29] : memref<3x4xf32, #tpu.memory_space<smem>>
    %36 = vector.broadcast %35 : f32 to vector<2x128xf32>
    %37 = arith.mulf %3, %36 : vector<2x128xf32>
    %38 = arith.addf %34, %37 : vector<2x128xf32>
    %c1_30 = arith.constant 1 : index
    %c2_31 = arith.constant 2 : index
    %39 = memref.load %arg2[%c1_30, %c2_31] : memref<3x4xf32, #tpu.memory_space<smem>>
    %40 = vector.broadcast %39 : f32 to vector<2x128xf32>
    %41 = arith.mulf %5, %40 : vector<2x128xf32>
    %42 = arith.addf %38, %41 : vector<2x128xf32>
    %c1_32 = arith.constant 1 : index
    %c3_33 = arith.constant 3 : index
    %43 = memref.load %arg2[%c1_32, %c3_33] : memref<3x4xf32, #tpu.memory_space<smem>>
    %44 = vector.broadcast %43 : f32 to vector<2x128xf32>
    %45 = arith.mulf %7, %44 : vector<2x128xf32>
    %46 = arith.addf %42, %45 : vector<2x128xf32>
    %c0_34 = arith.constant 0 : index
    %c1_35 = arith.constant 1 : index
    %c0_36 = arith.constant 0 : index
    %c0_37 = arith.constant 0 : index
    %47 = vector.load %arg5[%c0_34, %c1_35, %c0_36, %c0_37] : memref<1x3x2x128xf32, #tpu.memory_space<vmem>>, vector<1x1x2x128xf32>
    %48 = vector.shape_cast %47 : vector<1x1x2x128xf32> to vector<2x128xf32>
    %49 = vector.shape_cast %46 : vector<2x128xf32> to vector<1x1x2x128xf32>
    tpu.vector_store %arg5[%c0_34, %c1_35, %c0_36, %c0_37], %49 {strides = array<i32>} : memref<1x3x2x128xf32, #tpu.memory_space<vmem>>, vector<1x1x2x128xf32>,
    %c2_38 = arith.constant 2 : index
    %c0_39 = arith.constant 0 : index
    %50 = memref.load %arg2[%c2_38, %c0_39] : memref<3x4xf32, #tpu.memory_space<smem>>
    %51 = vector.broadcast %50 : f32 to vector<2x128xf32>
    %52 = arith.mulf %1, %51 : vector<2x128xf32>
    %c2_40 = arith.constant 2 : index
    %53 = memref.load %arg3[%c2_40] : memref<3xf32, #tpu.memory_space<smem>>
    %54 = vector.broadcast %53 : f32 to vector<2x128xf32>
    %55 = arith.addf %52, %54 : vector<2x128xf32>
    %c2_41 = arith.constant 2 : index
    %c1_42 = arith.constant 1 : index
    %56 = memref.load %arg2[%c2_41, %c1_42] : memref<3x4xf32, #tpu.memory_space<smem>>
    %57 = vector.broadcast %56 : f32 to vector<2x128xf32>
    %58 = arith.mulf %3, %57 : vector<2x128xf32>
    %59 = arith.addf %55, %58 : vector<2x128xf32>
    %c2_43 = arith.constant 2 : index
    %c2_44 = arith.constant 2 : index
    %60 = memref.load %arg2[%c2_43, %c2_44] : memref<3x4xf32, #tpu.memory_space<smem>>
    %61 = vector.broadcast %60 : f32 to vector<2x128xf32>
    %62 = arith.mulf %5, %61 : vector<2x128xf32>
    %63 = arith.addf %59, %62 : vector<2x128xf32>
    %c2_45 = arith.constant 2 : index
    %c3_46 = arith.constant 3 : index
    %64 = memref.load %arg2[%c2_45, %c3_46] : memref<3x4xf32, #tpu.memory_space<smem>>
    %65 = vector.broadcast %64 : f32 to vector<2x128xf32>
    %66 = arith.mulf %7, %65 : vector<2x128xf32>
    %67 = arith.addf %63, %66 : vector<2x128xf32>
    %c0_47 = arith.constant 0 : index
    %c2_48 = arith.constant 2 : index
    %c0_49 = arith.constant 0 : index
    %c0_50 = arith.constant 0 : index
    %68 = vector.load %arg5[%c0_47, %c2_48, %c0_49, %c0_50] : memref<1x3x2x128xf32, #tpu.memory_space<vmem>>, vector<1x1x2x128xf32>
    %69 = vector.shape_cast %68 : vector<1x1x2x128xf32> to vector<2x128xf32>
    %70 = vector.shape_cast %67 : vector<2x128xf32> to vector<1x1x2x128xf32>
    tpu.vector_store %arg5[%c0_47, %c2_48, %c0_49, %c0_50], %70 {strides = array<i32>} : memref<1x3x2x128xf32, #tpu.memory_space<vmem>>, vector<1x1x2x128xf32>,
    return
  }
  func.func @transform_0(%arg0: i32, %arg1: i32) -> (i32, i32) {
    %c0_i32 = arith.constant 0 : i32
    %c0_i32_0 = arith.constant 0 : i32
    %c0_i32_1 = arith.constant 0 : i32
    return %c0_i32, %c0_i32_0 : i32, i32
  }
  func.func @transform_1(%arg0: i32, %arg1: i32) -> i32 {
    %c0_i32 = arith.constant 0 : i32
    %c0_i32_0 = arith.constant 0 : i32
    return %c0_i32 : i32
  }
  func.func @transform_2(%arg0: i32, %arg1: i32) -> (i32, i32, i32, i32) {
    %c0_i32 = arith.constant 0 : i32
    %c0_i32_0 = arith.constant 0 : i32
    %c0_i32_1 = arith.constant 0 : i32
    return %arg0, %c0_i32, %arg1, %c0_i32_0 : i32, i32, i32, i32
  }
  func.func @transform_3(%arg0: i32, %arg1: i32) -> (i32, i32, i32, i32) {
    %c0_i32 = arith.constant 0 : i32
    %c0_i32_0 = arith.constant 0 : i32
    %c0_i32_1 = arith.constant 0 : i32
    return %arg0, %c0_i32, %arg1, %c0_i32_0 : i32, i32, i32, i32
  }
}

</mosaic_0001>

<bundles_post_ra>
// kernel: tpu_custom_call.1
= control target key start
LH: loop header
LB: loop body
LE: loop exit
PB: predicated region body
PF: predicated region fallthrough
CT: control target
= control target key end

     0   :  { %8 = vsyncpa [#allocation5], 0  ;;  %s961_s0 = inlined_call_operand.hbm [shape: f32[3,4], index: 0, kind: input, shape index: {}]   ;;  %s962_s1 = inlined_call_operand.vmem [shape: f32[3], index: 1, kind: input, shape index: {}]   ;;  %s963_s2 = inlined_call_operand.hbm [shape: f32[2,4,2,128], index: 2, kind: input, shape index: {}]   ;;  %s964_s3 = inlined_call_operand.hbm [shape: f32[2,3,2,128], index: 3, kind: output, shape index: {}]  }
   0x1   :  { %9 = vsyncpa [#allocation6], 0 }
   0x2   :  { %10 = vsyncpa [#allocation3], 0 }
   0x3   :  { %12 = vsyncpa [#allocation3 + $0x1], 0 }
   0x4   :  { %13 = vsyncpa [#allocation4], 0 }
   0x5   :  { %15 = vsyncpa [#allocation4 + $0x1], 0  ;;  %s723_s12 = smov 0   ;;  %s725_s13 = smov 0  }
   0x6   :  { %s727_s14 = smov 0   ;;  %s729_s15 = smov 0  }
   0x7   :  { %s731_s16 = smov 0   ;;  %s733_s17 = smov 0  }
   0x8 LB: > { %s421_s18 = sadd.s32 4294967295, %s693_s17   ;;  %s422_s19 = sadd.s32 4294967294, %s693_s17   ;;  %s693_s17 = sphi %s733_s17, %s21_s17   ;;  %s689_s16 = sphi %s731_s16, %s985_s16   ;;  %s685_s15 = sphi %s729_s15, %s984_s15   ;;  %s681_s14 = sphi %s727_s14, %s983_s14   ;;  %s677_s13 = sphi %s725_s13, %s982_s13   ;;  %s673_s12 = sphi %s723_s12, %s981_s12  }
   0x9   : > { %s84_s20 = sadd.s32 1, %s681_s14  ;;  %p91_p0 = scmp.ne.s32.totalorder %s681_s14, %s677_s13 }
   0xa   : > { %p92_p1 = scmp.eq.s32.totalorder %s693_s17, 0  ;;  %p97_p2 = scmp.ne.s32.totalorder %s677_s13, %s673_s12 }
   0xb   : > { %p761_p3 = scmp.eq.s32.totalorder %s421_s18, 0  ;;  %p123_p4 = scmp.eq.s32.totalorder %s421_s18, 1 }
   0xc   : > { %p93_p5 = por %p92_p1, %p91_p0  ;;  %p129_p6 = scmp.eq.s32.totalorder %s422_s19, 1 }
   0xd   : > { %s969_s21 = scalar_select %p761_p3, 1, 0 }
   0xe   : > { %p767_p7 = por %p761_p3, %p97_p2  ;;  %p771_p8 = por %p123_p4, %p91_p0 }
   0xf   : > { %p775_p9 = por %p129_p6, %p97_p2  ;;  %p423_p10 = scmp.ge.s32.totalorder %s693_s17, 1 }
  0x10   : > { %s970_s22 = scalar_select %p767_p7, 1, 0 }
  0x11   : > { %s971_s23 = scalar_select %p771_p8, 1, 0 }
  0x12   : > { %s972_s24 = scalar_select %p775_p9, 1, 0 }
  0x13   : > { %p136_p11 = scmp.lt.s32.totalorder %s693_s17, 3  ;;  %p487_p1 = scmp.lt.s32.totalorder %s693_s17, 2 }
  0x14   : > { %s158_s28 = sshll.u32 %s962_s1, 4  ;;  %s169_s4 = sand.u32 1, %s681_s14   ;;  %s159_s28 = int_to_ptr.vmem [resolvable:$true] %s158_s28 }
  0x15   : > { %p782_p13 = pnand %p423_p10, %p136_p11  ;;  %p792_p4 = pnand %p487_p1, %p93_p5 }
  0x16   : > { %s33_s5 = sadd.s32 1, %s689_s16  ;;  %s545_s8 = scalar_lea.hbm %s961_s0, 64 }
  0x17   : > { %p470_p0 = pneg %p782_p13  ;;  %p546_p5 = scmp.ne.s32.totalorder %s961_s0, %s545_s8 }
  0x18   : > { %p552_p1 = scmp.lt.u32.totalorder %s545_s8, %s961_s0 }
  0x19   : > { %p798_p2 = pnand %p470_p0, %p761_p3 }
  0x1b   : > { %p547_p6 = pneg %p798_p2 }
  0x1d   : > { %p548_p10 = pnand %p547_p6, %p546_p5 }
  0x1f   : > { %p549_p11 = pneg %p548_p10 }
  0x21   : > { %p554_p0 = pnand %p552_p1, %p549_p11 }
  0x23   : > { %557 = shalt.err (!%p554_p0)
}
  0x24   : > { %s695_s19 = smov [#allocation2]   ;;  %s558_s6 = scalar_lea.vmem %s159_s28, 16 }
  0x25   : > { %473 = dma.hbm_to_smem (!%p798_p2), %s961_s0, 64, %s695_s19, [#allocation5]  }
  0x26   : > { %p559_p12 = scmp.ne.s32.totalorder %s159_s28, %s558_s6  ;;  %p566_p7 = scmp.lt.s32.totalorder %s159_s28, %s159_s28 }
  0x27   : > { %p567_p5 = scmp.lt.s32.totalorder %s558_s6, %s558_s6 }
  0x28   : > { %p561_p9 = pnand %p559_p12, %p547_p6 }
  0x29   : > { %p568_p10 = por %p567_p5, %p566_p7 }
  0x2a   : > { %p562_p8 = pneg %p561_p9 }
  0x2c   : > { %p569_p3 = pnand %p568_p10, %p562_p8 }
  0x2e   : > { %572 = shalt.err (!%p569_p3)
}
  0x2f   : > { %s696_s7 = smov [#allocation7]   ;;  %p35_p11 = scmp.ge.s32.totalorder %s33_s5, 2 }
  0x30   : > { %476 = dma.vmem_to_smem (!%p798_p2), %s159_s28, 16, %s696_s7, [#allocation6]  }
  0x31   : > { %s427_s8 = sshll.u32 %s169_s4, 3  ;;  %s455_s9 = sshll.u32 %s689_s16, 7 }
  0x32   : > { %s987_s5 = smov (%p35_p11, %s33_s5), 0  ;;  %s830_s30 = scalar_lea.hbm %s963_s2, %s455_s9 }
  0x33   : > { %s79_s18 = ssub.s32 %s689_s16, %s987_s5  ;;  %s173_s19 = scalar_lea.vmem [#allocation8], %s427_s8 }
  0x34   : > { %s181_s28 = sshll.u32 %s173_s19, 4  ;;  %p82_p3 = scmp.eq.s32.totalorder %s79_s18, 0  ;;  %s834_s28 = int_to_ptr.vmem [resolvable:$true] %s181_s28 }
  0x35   : > { %s843_s27 = scalar_lea.sflag [#allocation3], %s169_s4  ;;  %s573_s6 = scalar_lea.hbm %s830_s30, 128 }
  0x36   : > { %s839_s26 = scalar_select %p82_p3, %s681_s14, %s84_s20  }
  0x37   : > { %p574_p7 = scmp.ne.s32.totalorder %s830_s30, %s573_s6  ;;  %p575_p8 = pneg %p792_p4 }
  0x38   : > { %s578_s9 = scalar_lea.hbm %s963_s2, 256  ;;  %p579_p2 = scmp.lt.u32.totalorder %s830_s30, %s963_s2 }
  0x39   : > { %p576_p9 = pnand %p575_p8, %p574_p7  ;;  %p580_p6 = scmp.lt.u32.totalorder %s578_s9, %s573_s6 }
  0x3a   : > { %p582_p0 = scmp.lt.u32.totalorder %s573_s6, %s830_s30 }
  0x3b   : > { %p577_p12 = pneg %p576_p9  ;;  %p581_p1 = por %p580_p6, %p579_p2 }
  0x3d   : > { %p583_p5 = por %p582_p0, %p581_p1 }
  0x3f   : > { %p584_p10 = pnand %p583_p5, %p577_p12 }
  0x41   : > { %587 = shalt.err (!%p584_p10)
}
  0x42   : > { %s588_s20 = scalar_lea.vmem %s834_s28, 128  ;;  %s697_s4 = smov [#allocation8]  }
  0x43   : > { %p589_p11 = scmp.ne.s32.totalorder %s834_s28, %s588_s20  ;;  %s593_s18 = sshll.u32 %s697_s4, 4  ;;  %s594_s18 = int_to_ptr.vmem [resolvable:$false] %s593_s18 }
  0x44   : > { %s595_s19 = scalar_lea.vmem %s594_s18, 256  ;;  %p596_p9 = scmp.lt.s32.totalorder %s834_s28, %s594_s18 }
  0x45   : > { %p591_p3 = pnand %p589_p11, %p575_p8  ;;  %p597_p2 = scmp.lt.s32.totalorder %s595_s19, %s588_s20 }
  0x47   : > { %p592_p7 = pneg %p591_p3  ;;  %p598_p6 = por %p597_p2, %p596_p9 }
  0x49   : > { %p599_p1 = pnand %p598_p6, %p592_p7 }
  0x4b   : > { %602 = shalt.err (!%p599_p1)
}
  0x4c   : > { %s698_s6 = smov 32   ;;  %s699_s7 = smov 2  }
  0x4d   : > { %480 = dma.hbm_to_vmem [thread:$0]  (!%p792_p4), %s830_s30, 128, %s834_s28, %s843_s27, %s698_s6, %s698_s6, %s699_s7  }
  0x4e   : > { %193 = sbr.rel (%p782_p13) target bundleno = 132 (0x84), region = 32  ;;  %p976_p8 = scmp.ne.s32.totalorder (!%p782_p13), %s969_s21, 0 }
  0x55   : > { %656 = dma.done.wait (%p976_p8), [#allocation5], 64  }
  0x56   : > { %658 = vsyncadd (%p976_p8), [#allocation5], 4294967232 }
  0x57   : > { %660 = dma.done.wait (%p976_p8), [#allocation6], 16  }
  0x58   : > { %662 = vsyncadd (%p976_p8), [#allocation6], 4294967280  ;;  %s882_s8 = sand.u32 1, %s677_s13   ;;  %p977_p13 = scmp.ne.s32.totalorder %s970_s22, 0 }
  0x59   : > { %s433_s25 = sshll.u32 %s882_s8, 3  ;;  %s204_s29 = scalar_lea.sflag [#allocation3], %s882_s8 }
  0x5a   : > { %s207_s30 = scalar_lea.vmem [#allocation8], %s433_s25 }
  0x5b   : > { %664 = dma.done.wait (%p977_p13), %s204_s29, 128  }
  0x5c   : > { %666 = vsyncadd (%p977_p13), %s204_s29, 4294967168 }
  0x5d   : > { %212 = sfence }
  0x5e   : > { %s238_s28 = sld [smem:[#allocation2]]  ;;  %s437_s9 = sld [smem:[#allocation2 + $0x1]]  ;;  %v231_v0 = vld [vmem:[%s207_s30] sm:$0x3]  ;;  %v434_v1 = vld [vmem:[%s207_s30 + $0x2] sm:$0x3] }
  0x5f   : > { %s241_s27 = sld [smem:[#allocation7]]  ;;  %s438_s21 = sld [smem:[#allocation2 + $0x2]]  ;;  %v435_v2 = vld [vmem:[%s207_s30 + $0x4] sm:$0x3]  ;;  %v436_v4 = vld [vmem:[%s207_s30 + $0x6] sm:$0x3] }
  0x60   : > { %s439_s10 = sld [smem:[#allocation2 + $0x3]]  ;;  %s440_s11 = sld [smem:[#allocation2 + $0x80]] }
  0x61   : > { %s890_s20 = sld [smem:[#allocation7 + $0x1]]  ;;  %s443_s18 = sld [smem:[#allocation2 + $0x82]] }
  0x62   : > { %s442_s4 = sld [smem:[#allocation2 + $0x81]]  ;;  %s444_s19 = sld [smem:[#allocation2 + $0x83]] }
  0x63   : > { %s892_s22 = sld [smem:[#allocation2 + $0x100]]  ;;  %s894_s6 = sld [smem:[#allocation7 + $0x2]] }
  0x64   : > { %v239_v3 = vstv %s238_s28  ;;  %v245_v7 = vstv %s437_s9  ;;  %s448_s7 = sld [smem:[#allocation2 + $0x101]]  ;;  %s896_s25 = sld [smem:[#allocation2 + $0x102]] }
  0x65   : > { %v240_v5 = vmul.f32 %v239_v3, %v231_v0  ;;  %v242_v6 = vstv %s241_s27  ;;  %v249_v8 = vstv %s438_s21  ;;  %v246_v10 = vmul.f32 %v434_v1, %v245_v7  ;;  %s898_s29 = sld [smem:[#allocation2 + $0x103]]  ;;  %s456_s30 = smul.u32 6, %s882_s8 }
  0x66   : > { %v250_v11 = vmul.f32 %v435_v2, %v249_v8  ;;  %v253_v12 = vstv %s439_s10  ;;  %v258_v14 = vstv %s440_s11  ;;  %s457_s9 = smul.u32 96, %s685_s15  ;;  %p978_p12 = scmp.ne.s32.totalorder %s971_s23, 0 }
  0x67   : > { %v243_v9 = vadd.f32 %v242_v6, %v240_v5  ;;  %v254_v13 = vmul.f32 %v436_v4, %v253_v12  ;;  %v259_v16 = vmul.f32 %v258_v14, %v231_v0  ;;  %v261_v17 = vstv %s890_s20  ;;  %s230_s28 = scalar_lea.vmem [#allocation9], %s456_s30  ;;  %s298_s20 = scalar_lea.sflag [#allocation4], %s882_s8 }
  0x68   : > { %v264_v18 = vstv %s442_s4  ;;  %v268_v20 = vstv %s443_s18  ;;  %v272_v21 = vstv %s444_s19  ;;  %s312_s27 = sshll.u32 %s230_s28, 4  ;;  %s912_s11 = scalar_lea.hbm %s964_s3, %s457_s9  ;;  %s907_s27 = int_to_ptr.vmem [resolvable:$true] %s312_s27 }
  0x69   : > { %v247_v15 = vadd.f32 %v246_v10, %v243_v9  ;;  %v265_v19 = vmul.f32 %v434_v1, %v264_v18  ;;  %v262_v23 = vadd.f32 %v261_v17, %v259_v16  ;;  %v269_v24 = vmul.f32 %v435_v2, %v268_v20  ;;  %s603_s4 = scalar_lea.vmem %s907_s27, 96  ;;  %s700_s15 = smov [#allocation9]  }
  0x6a   : > { %v273_v25 = vmul.f32 %v436_v4, %v272_v21  ;;  %v278_v26 = vstv %s892_s22  ;;  %v281_v27 = vstv %s894_s6  ;;  %v284_v28 = vstv %s448_s7  ;;  %p604_p4 = scmp.ne.s32.totalorder %s907_s27, %s603_s4  ;;  %s607_s18 = sshll.u32 %s700_s15, 4  ;;  %s608_s18 = int_to_ptr.vmem [resolvable:$false] %s607_s18 }
  0x6b   : > { %v251_v22 = vadd.f32 %v250_v11, %v247_v15  ;;  %v288_v29 = vstv %s896_s25  ;;  %v266_v31 = vadd.f32 %v265_v19, %v262_v23  ;;  %v279_v32 = vmul.f32 %v278_v26, %v231_v0  ;;  %s609_s19 = scalar_lea.vmem %s608_s18, 192  ;;  %p610_p10 = scmp.lt.s32.totalorder %s907_s27, %s608_s18 }
  0x6c   : > { %v285_v33 = vmul.f32 %v434_v1, %v284_v28  ;;  %v292_v34 = vstv %s898_s29  ;;  %v289_v37 = vmul.f32 %v435_v2, %v288_v29  ;;  %p605_p0 = pnand %p604_p4, %p978_p12  ;;  %p611_p11 = scmp.lt.s32.totalorder %s609_s19, %s603_s4 }
  0x6d   : > { %v255_v30 = vadd.f32 %v254_v13, %v251_v22  ;;  %v270_v35 = vadd.f32 %v269_v24, %v266_v31  ;;  %v282_v36 = vadd.f32 %v281_v27, %v279_v32  ;;  %v293_v40 = vmul.f32 %v436_v4, %v292_v34 }
  0x6e   : > { %p606_p5 = pneg %p605_p0  ;;  %p612_p3 = por %p611_p11, %p610_p10 }
  0x6f   : > { %256 = vst [vmem:[%s230_s28] sm:$0x3] %v255_v30  ;;  %v274_v38 = vadd.f32 %v273_v25, %v270_v35  ;;  %v286_v39 = vadd.f32 %v285_v33, %v282_v36 }
  0x70   : > { %p613_p7 = pnand %p612_p3, %p606_p5 }
  0x71   : > { %445 = vst [vmem:[%s230_s28 + $0x2] sm:$0x3] %v274_v38  ;;  %v290_v41 = vadd.f32 %v289_v37, %v286_v39 }
  0x73   : > { %v294_v42 = vadd.f32 %v293_v40, %v290_v41 }
  0x75   : > { %451 = vst [vmem:[%s230_s28 + $0x4] sm:$0x3] %v294_v42 }
  0x76   : > { %616 = shalt.err (!%p613_p7)
}
  0x77   : > { %s617_s22 = scalar_lea.hbm %s912_s11, 96  ;;  %s621_s25 = scalar_lea.hbm %s964_s3, 192 }
  0x78   : > { %p618_p9 = scmp.ne.s32.totalorder %s912_s11, %s617_s22  ;;  %p622_p1 = scmp.lt.u32.totalorder %s912_s11, %s964_s3 }
  0x79   : > { %p623_p8 = scmp.lt.u32.totalorder %s621_s25, %s617_s22  ;;  %p625_p4 = scmp.lt.u32.totalorder %s617_s22, %s912_s11 }
  0x7a   : > { %p619_p2 = pnand %p618_p9, %p978_p12 }
  0x7b   : > { %p624_p13 = por %p623_p8, %p622_p1 }
  0x7c   : > { %p620_p6 = pneg %p619_p2 }
  0x7d   : > { %p626_p0 = por %p625_p4, %p624_p13 }
  0x7f   : > { %p627_p5 = pnand %p626_p0, %p620_p6 }
  0x81   : > { %630 = shalt.err (!%p627_p5)
}
  0x82   : > { %s701_s28 = smov 32   ;;  %s702_s9 = smov 2  }
  0x83   : > { %468 = dma.vmem_to_hbm [thread:$0]  (%p978_p12), %s907_s27, 96, %s912_s11, %s298_s20, %s701_s28, %s701_s28, %s702_s9  }
  0x84 PF: > { %s327_s21 = sand.u32 1, %s673_s12   ;;  %p979_p10 = scmp.ne.s32.totalorder %s972_s24, 0 }
  0x85   : > { %p980_p11 = scmp.ge.s32.totalorder %s693_s17, 2  ;;  %s328_s10 = scalar_lea.sflag [#allocation4], %s327_s21 }
  0x87   : > { %p482_p3 = pnand %p980_p11, %p979_p10 }
  0x89   : > { %668 = dma.done.wait (!%p482_p3), %s328_s10, 96  }
  0x8a   : > { %670 = vsyncadd (!%p482_p3), %s328_s10, 4294967200  ;;  %s21_s17 = sadd.s32 1, %s693_s17   ;;  %s981_s12 = smov %s677_s13 }
  0x8b   : > { %p18_p7 = scmp.ge.s32.totalorder %s21_s17, 4   ;;  %s982_s13 = smov %s681_s14 }
  0x8c   : > { %s983_s14 = smov %s839_s26  ;;  %s984_s15 = smov %s689_s16 }
  0x8d   : > { %s985_s16 = smov %s987_s5  ;;  %20 = sbr.rel (!%p18_p7) target bundleno = 8 (0x8), region = 92 }
  0x94   :  { %333 = vsyncpa [#allocation3], 1 }
  0x95   :  { %335 = vsyncpa [#allocation3 + $0x1], 1 }
  0x96   :  { %336 = vsyncpa [#allocation4], 1 }
  0x97   :  { %338 = vsyncpa [#allocation4 + $0x1], 1 }
  0x98   :  { %339 = vsyncpa [#allocation5], 1 }
  0x99   :  { %341 = vsyncpa [#allocation5 + $0x1], 1 }
  0x9a   :  { %342 = vsyncpa [#allocation6], 1 }
  0x9b   :  { %344 = vsyncpa [#allocation6 + $0x1], 1 }

</bundles_post_ra>
